<compile_context>
chip_gen: v6e
topology: v6e:2x2x1
jax: 0.10.0
libtpu: 0.0.40
codegen_flags: <defaults>
</compile_context>

<pallas_src>
import numpy as np
import jax
import jax.numpy as jnp
from jax.experimental import pallas as pl
from jax.experimental.pallas import tpu as pltpu


HIDDEN = 256


def _head_pad(taskcla):
    total_out = sum(n for _, n in taskcla)
    return int(np.ceil(total_out / 128.0) * 128)


# ----------------------------------------------------------------------------
# Kernel: gates = sigmoid(s*efc[t]);  fc1 -> relu -> *g1 -> fc2 -> relu -> *g2
#         -> stacked (zero-padded) task heads.
# ----------------------------------------------------------------------------
def net_kernel(t_ref,                                   # scalar-prefetch (SMEM, (1,) i32)
               x_ref, w1_ref, b12_ref, w2_ref, e_ref, s_ref, wl_ref, bl_ref,
               y_ref, g_ref):
    del t_ref  # consumed only by the embedding-row index_map
    s = s_ref[0]                                        # SMEM scalar (f32)

    # HAT masks: sigmoid(s * embedding_rows), both gates from one (2, HIDDEN) block.
    g = jax.nn.sigmoid(s * e_ref[0])                    # (2, 256), f32
    g_ref[...] = g                                      # written every tile (same value)
    g1 = g[0:1, :]                                      # (1, 256)
    g2 = g[1:2, :]                                      # (1, 256)

    # h = drop1(relu(fc1(x))) * gfc1     (dropout = identity, eval mode)
    h = jnp.dot(x_ref[...], w1_ref[...],
                preferred_element_type=jnp.float32) + b12_ref[0:1, :]
    h = jnp.maximum(h, 0.0) * g1                        # (TB, 256), f32

    # h = drop2(relu(fc2(h))) * gfc2
    h = jnp.dot(h.astype(jnp.bfloat16), w2_ref[...],
                preferred_element_type=jnp.float32) + b12_ref[1:2, :]
    h = jnp.maximum(h, 0.0) * g2

    # stacked, zero-padded task heads: lane-dense (TB, head_pad) store
    y_ref[...] = jnp.dot(h.astype(jnp.bfloat16), wl_ref[...],
                         preferred_element_type=jnp.float32) + bl_ref[...]


# ----------------------------------------------------------------------------
# Wrapper
# ----------------------------------------------------------------------------
def net_forward(t, x, params, taskcla, s=1.0):
    """Mimics Net.forward(t, x, s).  Returns (list_of_task_logits, [gfc1, gfc2])."""
    B = x.shape[0]
    in_dim = int(np.prod(x.shape[1:]))
    x_flat = x.reshape(B, in_dim).astype(jnp.bfloat16)  # x.view(B, -1), bf16 MXU operand

    n_per_task = [n for _, n in taskcla]
    total_out = sum(n_per_task)
    head_pad = _head_pad(taskcla)

    # Batch tiling: only worth it for large B (amortize the weight DMA across grid
    # steps; weights have constant index_maps so they stay VMEM-resident).
    if B >= 256 and B % 128 == 0:
        TB = 128
    else:
        TB = B
    num_tiles = B // TB

    t_arr = jnp.asarray([t], dtype=jnp.int32)           # scalar-prefetch task index
    s_arr = jnp.asarray([s], dtype=jnp.float32)         # SMEM scalar

    def resident_spec(shape):
        # whole-array VMEM block, constant index_map -> stays resident across the grid
        return pl.BlockSpec(shape, lambda i, t_ref, _n=len(shape): (0,) * _n)

    def batch_spec(cols):
        # batch-tiled block (TB, cols)
        return pl.BlockSpec((TB, cols), lambda i, t_ref: (i, 0))

    # NOTE: emb block dim 0 must stay == 1 so the returned block index equals the
    # task index (a direct row gather).  Changing it silently breaks the gather.
    emb_spec = pl.BlockSpec((1, 2, HIDDEN), lambda i, t_ref: (t_ref[0], 0, 0))
    smem_spec = pl.BlockSpec(memory_space=pltpu.MemorySpace.SMEM)

    grid_spec = pltpu.PrefetchScalarGridSpec(
        num_scalar_prefetch=1,
        grid=(num_tiles,),
        in_specs=[
            batch_spec(in_dim),                  # x
            resident_spec((in_dim, HIDDEN)),     # w1
            resident_spec((2, HIDDEN)),          # b1/b2 packed
            resident_spec((HIDDEN, HIDDEN)),     # w2
            emb_spec,                            # stacked efc rows (selected by t)
            smem_spec,                           # s (SMEM scalar)
            resident_spec((HIDDEN, head_pad)),   # w_last (stacked, zero-padded)
            resident_spec((1, head_pad)),        # b_last
        ],
        out_specs=(
            batch_spec(head_pad),                # y (lane-dense, padded)
            resident_spec((2, HIDDEN)),          # gfc1/gfc2 packed
        ),
    )

    # Advisory cost so XLA overlaps the wrapper's reshape/astype/slice with the call.
    flops = 2 * B * HIDDEN * (in_dim + HIDDEN + head_pad)
    bytes_accessed = (
        B * in_dim * 2 + in_dim * HIDDEN * 2 + HIDDEN * HIDDEN * 2
        + HIDDEN * head_pad * 2                       # bf16 x / weights
        + (2 * HIDDEN + head_pad + 2 * HIDDEN) * 4    # f32 biases / emb row
        + (B * head_pad + 2 * HIDDEN) * 4             # f32 outputs
    )
    cost = pl.CostEstimate(flops=flops, transcendentals=2 * HIDDEN,
                           bytes_accessed=bytes_accessed)

    y_pad, g_packed = pl.pallas_call(
        net_kernel,
        out_shape=(
            jax.ShapeDtypeStruct((B, head_pad), jnp.float32),
            jax.ShapeDtypeStruct((2, HIDDEN), jnp.float32),
        ),
        grid_spec=grid_spec,
        compiler_params=pltpu.CompilerParams(dimension_semantics=("arbitrary",)),
        cost_estimate=cost,
    )(t_arr, x_flat, params["w1"], params["b12"], params["w2"],
      params["efc"], s_arr, params["w_last"], params["b_last"])

    # Unpack gates; slice the valid head columns once and split per task.
    gfc1 = g_packed[0:1, :]
    gfc2 = g_packed[1:2, :]
    y_valid = y_pad[:, :total_out]
    split_points = list(np.cumsum(n_per_task)[:-1])
    y = jnp.split(y_valid, split_points, axis=1) if split_points else [y_valid]
    return y, [gfc1, gfc2]


def init_params(key, in_dim, taskcla):
    """Deterministic parameter init (shapes match the PyTorch module)."""
    ks = jax.random.split(key, 8)
    n_tasks = len(taskcla)
    total_out = sum(n for _, n in taskcla)
    head_pad = _head_pad(taskcla)

    def unif(k, shape, fan_in):
        bound = 1.0 / jnp.sqrt(fan_in)
        return jax.random.uniform(k, shape, jnp.float32, -bound, bound)

    # task heads stacked and zero-padded to a lane-dense width
    w_last = jnp.zeros((HIDDEN, head_pad), jnp.float32)
    w_last = w_last.at[:, :total_out].set(unif(ks[4], (HIDDEN, total_out), HIDDEN))
    b_last = jnp.zeros((1, head_pad), jnp.float32)
    b_last = b_last.at[:, :total_out].set(unif(ks[5], (1, total_out), HIDDEN))

    # fc1/fc2 biases packed into one (2, HIDDEN) f32 array (row 0 = b1, row 1 = b2)
    b12 = jnp.concatenate(
        [unif(ks[1], (1, HIDDEN), in_dim), unif(ks[3], (1, HIDDEN), HIDDEN)], axis=0)

    # efc1/efc2 embeddings (Embedding(n_tasks, 256), N(0,1)) stacked into
    # (n_tasks, 2, HIDDEN): [:, 0] = efc1 row, [:, 1] = efc2 row.
    efc = jnp.stack(
        [jax.random.normal(ks[6], (n_tasks, HIDDEN), jnp.float32),
         jax.random.normal(ks[7], (n_tasks, HIDDEN), jnp.float32)], axis=1)

    params = {
        # fc1: Linear(in_dim, 256) — stored as (in, out); bf16 for the MXU
        "w1": unif(ks[0], (in_dim, HIDDEN), in_dim).astype(jnp.bfloat16),
        # fc2: Linear(256, 256)
        "w2": unif(ks[2], (HIDDEN, HIDDEN), HIDDEN).astype(jnp.bfloat16),
        "b12": b12,                                                   # f32
        # stacked task heads
        "w_last": w_last.astype(jnp.bfloat16),
        "b_last": b_last,                                             # f32
        # stacked HAT embeddings
        "efc": efc,                                                   # f32
    }
    return params


if __name__ == "__main__":
    # inputsize = (ncha, size, size) = (1, 16, 16)  ->  flattened dim 256
    ncha, size = 1, 16
    in_dim = ncha * size * size
    taskcla = [(0, 10), (1, 10)]          # two tasks, 10 classes each
    B = 8

    key = jax.random.PRNGKey(0)
    k_param, k_x = jax.random.split(key)
    params = init_params(k_param, in_dim, taskcla)

    x = jax.random.normal(k_x, (B, ncha, size, size), jnp.float32)  # NCHW like PyTorch
    t = 1                                                           # task index

    y, masks = net_forward(t, x, params, taskcla, s=1.0)
    jax.block_until_ready(y)
    jax.block_until_ready(masks)

    assert len(y) == len(taskcla)
    assert y[0].shape == (B, 10) and y[1].shape == (B, 10)
    assert masks[0].shape == (1, 256) and masks[1].shape == (1, 256)
    print("KERNEL_OK")
</pallas_src>

<mosaic_0001>
module attributes {stable_mosaic.version = 11 : i64} {
  func.func @net_kernel(%arg0: i32, %arg1: memref<1xi32, #tpu.memory_space<smem>>, %arg2: memref<8x256xbf16, #tpu.memory_space<vmem>>, %arg3: memref<256x256xbf16, #tpu.memory_space<vmem>>, %arg4: memref<2x256xf32, #tpu.memory_space<vmem>>, %arg5: memref<256x256xbf16, #tpu.memory_space<vmem>>, %arg6: memref<1x2x256xf32, #tpu.memory_space<vmem>>, %arg7: memref<1xf32, #tpu.memory_space<smem>>, %arg8: memref<256x128xbf16, #tpu.memory_space<vmem>>, %arg9: memref<1x128xf32, #tpu.memory_space<vmem>>, %arg10: memref<8x128xf32, #tpu.memory_space<vmem>>, %arg11: memref<2x256xf32, #tpu.memory_space<vmem>>) attributes {dimension_semantics = [#tpu.dimension_semantics<arbitrary>], iteration_bounds = array<i64: 1>, scalar_prefetch = 1 : i64, scratch_operands = 0 : i64, tpu.core_type = #tpu.core_type<tc>, window_params = [{transform_indices = @transform_0, window_bounds = array<i64: 8, 256>}, {pipeline_mode = #tpu.pipeline_mode<synchronous>, transform_indices = @transform_1, window_bounds = array<i64: 256, 256>}, {pipeline_mode = #tpu.pipeline_mode<synchronous>, transform_indices = @transform_2, window_bounds = array<i64: 2, 256>}, {pipeline_mode = #tpu.pipeline_mode<synchronous>, transform_indices = @transform_3, window_bounds = array<i64: 256, 256>}, {transform_indices = @transform_4, window_bounds = array<i64: 1, 2, 256>}, {transform_indices = @transform_5, window_bounds = array<i64: 1>}, {pipeline_mode = #tpu.pipeline_mode<synchronous>, transform_indices = @transform_6, window_bounds = array<i64: 256, 128>}, {pipeline_mode = #tpu.pipeline_mode<synchronous>, transform_indices = @transform_7, window_bounds = array<i64: 1, 128>}, {transform_indices = @transform_8, window_bounds = array<i64: 8, 128>}, {pipeline_mode = #tpu.pipeline_mode<synchronous>, transform_indices = @transform_9, window_bounds = array<i64: 2, 256>}]} {
    %c0 = arith.constant 0 : index
    %0 = memref.load %arg7[%c0] : memref<1xf32, #tpu.memory_space<smem>>
    %c0_0 = arith.constant 0 : index
    %c0_1 = arith.constant 0 : index
    %c0_2 = arith.constant 0 : index
    %1 = vector.load %arg6[%c0_0, %c0_1, %c0_2] : memref<1x2x256xf32, #tpu.memory_space<vmem>>, vector<1x2x256xf32>
    %2 = vector.shape_cast %1 : vector<1x2x256xf32> to vector<2x256xf32>
    %3 = vector.broadcast %0 : f32 to vector<2x256xf32>
    %4 = arith.mulf %3, %2 : vector<2x256xf32>
    %5 = arith.negf %4 : vector<2x256xf32>
    %6 = math.exp %5 : vector<2x256xf32>
    %cst = arith.constant 1.000000e+00 : f32
    %7 = vector.broadcast %cst : f32 to vector<2x256xf32>
    %8 = arith.addf %7, %6 : vector<2x256xf32>
    %9 = arith.divf %7, %8 : vector<2x256xf32>
    %c0_3 = arith.constant 0 : index
    %c0_4 = arith.constant 0 : index
    %10 = vector.load %arg11[%c0_3, %c0_4] : memref<2x256xf32, #tpu.memory_space<vmem>>, vector<2x256xf32>
    tpu.vector_store %arg11[%c0_3, %c0_4], %9 {strides = array<i32>} : memref<2x256xf32, #tpu.memory_space<vmem>>, vector<2x256xf32>,
    %11 = vector.extract_strided_slice %9 {offsets = [0, 0], sizes = [1, 256], strides = [1, 1]} : vector<2x256xf32> to vector<1x256xf32>
    %12 = vector.extract_strided_slice %9 {offsets = [1, 0], sizes = [1, 256], strides = [1, 1]} : vector<2x256xf32> to vector<1x256xf32>
    %c0_5 = arith.constant 0 : index
    %c0_6 = arith.constant 0 : index
    %13 = vector.load %arg2[%c0_5, %c0_6] : memref<8x256xbf16, #tpu.memory_space<vmem>>, vector<8x256xbf16>
    %c0_7 = arith.constant 0 : index
    %c0_8 = arith.constant 0 : index
    %14 = vector.load %arg3[%c0_7, %c0_8] : memref<256x256xbf16, #tpu.memory_space<vmem>>, vector<256x256xbf16>
    %cst_9 = arith.constant dense<0.000000e+00> : vector<8x256xf32>
    %15 = tpu.matmul %13, %14, %cst_9 {dimension_numbers = #tpu.dot_dimension_numbers<[1], [0], [0], [1], [0, 0, 1, 1], [], []>} : vector<8x256xbf16>, vector<256x256xbf16>, vector<8x256xf32> -> vector<8x256xf32>
    %c0_10 = arith.constant 0 : index
    %c0_11 = arith.constant 0 : index
    %16 = vector.load %arg4[%c0_10, %c0_11] : memref<2x256xf32, #tpu.memory_space<vmem>>, vector<1x256xf32>
    %17 = vector.broadcast %16 : vector<1x256xf32> to vector<8x256xf32>
    %18 = arith.addf %15, %17 : vector<8x256xf32>
    %cst_12 = arith.constant 0.000000e+00 : f32
    %19 = vector.broadcast %cst_12 : f32 to vector<8x256xf32>
    %20 = arith.maximumf %18, %19 : vector<8x256xf32>
    %21 = vector.broadcast %11 : vector<1x256xf32> to vector<8x256xf32>
    %22 = arith.mulf %20, %21 : vector<8x256xf32>
    %23 = arith.truncf %22 : vector<8x256xf32> to vector<8x256xbf16>
    %c0_13 = arith.constant 0 : index
    %c0_14 = arith.constant 0 : index
    %24 = vector.load %arg5[%c0_13, %c0_14] : memref<256x256xbf16, #tpu.memory_space<vmem>>, vector<256x256xbf16>
    %cst_15 = arith.constant dense<0.000000e+00> : vector<8x256xf32>
    %25 = tpu.matmul %23, %24, %cst_15 {dimension_numbers = #tpu.dot_dimension_numbers<[1], [0], [0], [1], [0, 0, 1, 1], [], []>} : vector<8x256xbf16>, vector<256x256xbf16>, vector<8x256xf32> -> vector<8x256xf32>
    %c1 = arith.constant 1 : index
    %c0_16 = arith.constant 0 : index
    %26 = vector.load %arg4[%c1, %c0_16] : memref<2x256xf32, #tpu.memory_space<vmem>>, vector<1x256xf32>
    %27 = vector.broadcast %26 : vector<1x256xf32> to vector<8x256xf32>
    %28 = arith.addf %25, %27 : vector<8x256xf32>
    %cst_17 = arith.constant 0.000000e+00 : f32
    %29 = vector.broadcast %cst_17 : f32 to vector<8x256xf32>
    %30 = arith.maximumf %28, %29 : vector<8x256xf32>
    %31 = vector.broadcast %12 : vector<1x256xf32> to vector<8x256xf32>
    %32 = arith.mulf %30, %31 : vector<8x256xf32>
    %33 = arith.truncf %32 : vector<8x256xf32> to vector<8x256xbf16>
    %c0_18 = arith.constant 0 : index
    %c0_19 = arith.constant 0 : index
    %34 = vector.load %arg8[%c0_18, %c0_19] : memref<256x128xbf16, #tpu.memory_space<vmem>>, vector<256x128xbf16>
    %cst_20 = arith.constant dense<0.000000e+00> : vector<8x128xf32>
    %35 = tpu.matmul %33, %34, %cst_20 {dimension_numbers = #tpu.dot_dimension_numbers<[1], [0], [0], [1], [0, 0, 1, 1], [], []>} : vector<8x256xbf16>, vector<256x128xbf16>, vector<8x128xf32> -> vector<8x128xf32>
    %c0_21 = arith.constant 0 : index
    %c0_22 = arith.constant 0 : index
    %36 = vector.load %arg9[%c0_21, %c0_22] : memref<1x128xf32, #tpu.memory_space<vmem>>, vector<1x128xf32>
    %37 = vector.broadcast %36 : vector<1x128xf32> to vector<8x128xf32>
    %38 = arith.addf %35, %37 : vector<8x128xf32>
    %c0_23 = arith.constant 0 : index
    %c0_24 = arith.constant 0 : index
    %39 = vector.load %arg10[%c0_23, %c0_24] : memref<8x128xf32, #tpu.memory_space<vmem>>, vector<8x128xf32>
    tpu.vector_store %arg10[%c0_23, %c0_24], %38 {strides = array<i32>} : memref<8x128xf32, #tpu.memory_space<vmem>>, vector<8x128xf32>,
    return
  }
  func.func @transform_0(%arg0: i32, %arg1: memref<1xi32, #tpu.memory_space<smem>>) -> (i32, i32) {
    %c0_i32 = arith.constant 0 : i32
    %c0_i32_0 = arith.constant 0 : i32
    return %arg0, %c0_i32 : i32, i32
  }
  func.func @transform_1(%arg0: i32, %arg1: memref<1xi32, #tpu.memory_space<smem>>) -> (i32, i32) {
    %c0_i32 = arith.constant 0 : i32
    %c0_i32_0 = arith.constant 0 : i32
    %c0_i32_1 = arith.constant 0 : i32
    return %c0_i32, %c0_i32_0 : i32, i32
  }
  func.func @transform_2(%arg0: i32, %arg1: memref<1xi32, #tpu.memory_space<smem>>) -> (i32, i32) {
    %c0_i32 = arith.constant 0 : i32
    %c0_i32_0 = arith.constant 0 : i32
    %c0_i32_1 = arith.constant 0 : i32
    return %c0_i32, %c0_i32_0 : i32, i32
  }
  func.func @transform_3(%arg0: i32, %arg1: memref<1xi32, #tpu.memory_space<smem>>) -> (i32, i32) {
    %c0_i32 = arith.constant 0 : i32
    %c0_i32_0 = arith.constant 0 : i32
    %c0_i32_1 = arith.constant 0 : i32
    return %c0_i32, %c0_i32_0 : i32, i32
  }
  func.func @transform_4(%arg0: i32, %arg1: memref<1xi32, #tpu.memory_space<smem>>) -> (i32, i32, i32) {
    %c0 = arith.constant 0 : index
    %0 = memref.load %arg1[%c0] : memref<1xi32, #tpu.memory_space<smem>>
    %c0_i32 = arith.constant 0 : i32
    %c0_i32_0 = arith.constant 0 : i32
    %c0_i32_1 = arith.constant 0 : i32
    return %0, %c0_i32, %c0_i32_0 : i32, i32, i32
  }
  func.func @transform_5(%arg0: i32, %arg1: memref<1xi32, #tpu.memory_space<smem>>) -> i32 {
    %c0_i32 = arith.constant 0 : i32
    %c0_i32_0 = arith.constant 0 : i32
    return %c0_i32 : i32
  }
  func.func @transform_6(%arg0: i32, %arg1: memref<1xi32, #tpu.memory_space<smem>>) -> (i32, i32) {
    %c0_i32 = arith.constant 0 : i32
    %c0_i32_0 = arith.constant 0 : i32
    %c0_i32_1 = arith.constant 0 : i32
    return %c0_i32, %c0_i32_0 : i32, i32
  }
  func.func @transform_7(%arg0: i32, %arg1: memref<1xi32, #tpu.memory_space<smem>>) -> (i32, i32) {
    %c0_i32 = arith.constant 0 : i32
    %c0_i32_0 = arith.constant 0 : i32
    %c0_i32_1 = arith.constant 0 : i32
    return %c0_i32, %c0_i32_0 : i32, i32
  }
  func.func @transform_8(%arg0: i32, %arg1: memref<1xi32, #tpu.memory_space<smem>>) -> (i32, i32) {
    %c0_i32 = arith.constant 0 : i32
    %c0_i32_0 = arith.constant 0 : i32
    return %arg0, %c0_i32 : i32, i32
  }
  func.func @transform_9(%arg0: i32, %arg1: memref<1xi32, #tpu.memory_space<smem>>) -> (i32, i32) {
    %c0_i32 = arith.constant 0 : i32
    %c0_i32_0 = arith.constant 0 : i32
    %c0_i32_1 = arith.constant 0 : i32
    return %c0_i32, %c0_i32_0 : i32, i32
  }
}

</mosaic_0001>

<bundles_post_ra>
// kernel: tpu_custom_call.1
= control target key start
LH: loop header
LB: loop body
LE: loop exit
PB: predicated region body
PF: predicated region fallthrough
CT: control target
= control target key end

     0   :  { %18 = vsyncpa [#allocation6], 0  ;;  %s1396_s0 = inlined_call_operand.<no memory space> [shape: s32[1], index: 0, kind: input, shape index: {}]   ;;  %s1397_s1 = inlined_call_operand.hbm [shape: bf16[8,256], index: 1, kind: input, shape index: {}]   ;;  %s1398_s2 = inlined_call_operand.hbm [shape: bf16[256,256], index: 2, kind: input, shape index: {}]   ;;  %s1399_s3 = inlined_call_operand.hbm [shape: f32[2,256], index: 3, kind: input, shape index: {}]   ;;  %s1400_s4 = inlined_call_operand.hbm [shape: bf16[256,256], index: 4, kind: input, shape index: {}]   ;;  %s1401_s5 = inlined_call_operand.vmem [shape: f32[2,2,256], index: 5, kind: input, shape index: {}]   ;;  %s1402_s6 = inlined_call_operand.<no memory space> [shape: f32[1], index: 6, kind: input, shape index: {}]   ;;  %s1403_s7 = inlined_call_operand.hbm [shape: bf16[256,128], index: 7, kind: input, shape index: {}]   ;;  %s1404_s8 = inlined_call_operand.vmem [shape: f32[1,128], index: 8, kind: input, shape index: {}]   ;;  %s1405_s9 = inlined_call_operand.hbm [shape: f32[8,128], index: 9, kind: output, shape index: {0}]   ;;  %s1406_s10 = inlined_call_operand.hbm [shape: f32[2,256], index: 10, kind: output, shape index: {1}]  }
   0x1   :  { %19 = vsyncpa [#allocation9], 0 }
   0x2   :  { %20 = vsyncpa [#allocation12], 0 }
   0x3   :  { %21 = vsyncpa [#allocation7], 0 }
   0x4   :  { %22 = vsyncpa [#allocation16], 0  ;;  %s1281_s13 = smov [#allocation8]  }
   0x5   :  { %s38_s14 = sshll.u32 %s1281_s13, 4  ;;  %s39_s14 = int_to_ptr.vmem [resolvable:$true] %s38_s14 }
   0x6   :  { %s1139_s15 = scalar_lea.vmem %s39_s14, 4096  ;;  %p1144_p1 = scmp.lt.s32.totalorder %s39_s14, %s39_s14 }
   0x7   :  { %p1140_p0 = scmp.ne.s32.totalorder %s39_s14, %s1139_s15  ;;  %p1145_p2 = scmp.lt.s32.totalorder %s1139_s15, %s1139_s15 }
   0x9   :  { %p1146_p3 = por %p1145_p2, %p1144_p1 }
   0xb   :  { %p1147_p4 = pnand %p1146_p3, %p1140_p0 }
   0xd   :  { %1150 = shalt.err (!%p1147_p4)
}
   0xe   :  { %s1282_s16 = smov 128   ;;  %s1283_s17 = smov 8  }
   0xf   :  { %44 = dma.hbm_to_vmem [thread:$0]  %s1398_s2, 4096, %s39_s14, [#allocation9], %s1282_s16, %s1282_s16, %s1283_s17  }
  0x10   :  { %s1284_s20 = smov [#allocation11]   ;;  %s1285_s22 = smov [#allocation5]  }
  0x11   :  { %s60_s21 = sshll.u32 %s1284_s20, 4  ;;  %s29_s23 = sshll.u32 %s1285_s22, 4  ;;  %s61_s21 = int_to_ptr.vmem [resolvable:$true] %s60_s21  ;;  %s30_s23 = int_to_ptr.vmem [resolvable:$true] %s29_s23 }
  0x12   :  { %s1159_s24 = scalar_lea.vmem %s61_s21, 4096  ;;  %p1164_p6 = scmp.lt.s32.totalorder %s61_s21, %s61_s21 }
  0x13   :  { %p1160_p5 = scmp.ne.s32.totalorder %s61_s21, %s1159_s24  ;;  %p1165_p7 = scmp.lt.s32.totalorder %s1159_s24, %s1159_s24 }
  0x15   :  { %p1166_p8 = por %p1165_p7, %p1164_p6 }
  0x17   :  { %p1167_p9 = pnand %p1166_p8, %p1160_p5 }
  0x19   :  { %1170 = shalt.err (!%p1167_p9)
}
  0x1a   :  { %66 = dma.hbm_to_vmem [thread:$0]  %s1400_s4, 4096, %s61_s21, [#allocation12], %s1282_s16, %s1282_s16, %s1283_s17  }
  0x1b   :  { %s1179_s27 = scalar_lea.vmem %s30_s23, 128  ;;  %p1184_p11 = scmp.lt.s32.totalorder %s30_s23, %s30_s23 }
  0x1c   :  { %p1180_p10 = scmp.ne.s32.totalorder %s30_s23, %s1179_s27  ;;  %p1185_p12 = scmp.lt.s32.totalorder %s1179_s27, %s1179_s27 }
  0x1e   :  { %p1186_p13 = por %p1185_p12, %p1184_p11 }
  0x20   :  { %p1187_p0 = pnand %p1186_p13, %p1180_p10 }
  0x22   :  { %1190 = shalt.err (!%p1187_p0)
}
  0x23   :  { %32 = dma.hbm_to_vmem [thread:$0]  %s1397_s1, 128, %s30_s23, [#allocation6]  }
  0x24   :  { %s1286_s29 = smov [#allocation10]   ;;  %s1287_s11 = smov [#allocation13]  }
  0x25   :  { %s51_s30 = sshll.u32 %s1286_s29, 4  ;;  %s83_s12 = sshll.u32 %s1287_s11, 4  ;;  %s52_s30 = int_to_ptr.vmem [resolvable:$true] %s51_s30  ;;  %s84_s12 = int_to_ptr.vmem [resolvable:$true] %s83_s12 }
  0x26   :  { %s1199_s13 = scalar_lea.vmem %s52_s30, 64  ;;  %p1204_p2 = scmp.lt.s32.totalorder %s52_s30, %s52_s30 }
  0x27   :  { %p1200_p1 = scmp.ne.s32.totalorder %s52_s30, %s1199_s13  ;;  %p1205_p3 = scmp.lt.s32.totalorder %s1199_s13, %s1199_s13 }
  0x29   :  { %p1206_p4 = por %p1205_p3, %p1204_p2 }
  0x2b   :  { %p1207_p5 = pnand %p1206_p4, %p1200_p1 }
  0x2d   :  { %1210 = shalt.err (!%p1207_p5)
}
  0x2e   :  { %54 = dma.hbm_to_vmem [thread:$0]  %s1399_s3, 64, %s52_s30, [#allocation9]  }
  0x2f   :  { %s1219_s15 = scalar_lea.vmem %s84_s12, 2048  ;;  %p1224_p7 = scmp.lt.s32.totalorder %s84_s12, %s84_s12 }
  0x30   :  { %p1220_p6 = scmp.ne.s32.totalorder %s84_s12, %s1219_s15  ;;  %p1225_p8 = scmp.lt.s32.totalorder %s1219_s15, %s1219_s15 }
  0x32   :  { %p1226_p9 = por %p1225_p8, %p1224_p7 }
  0x34   :  { %p1227_p10 = pnand %p1226_p9, %p1220_p6 }
  0x36   :  { %1230 = shalt.err (!%p1227_p10)
}
  0x37   :  { %s1288_s1 = smov 64   ;;  %s1289_s16 = smov 4  }
  0x38   :  { %89 = dma.hbm_to_vmem [thread:$0]  %s1403_s7, 2048, %s84_s12, [#allocation12], %s1288_s1, %s1288_s1, %s1289_s16  }
  0x39   :  { %1271 = dma.done.wait [#allocation6], 128  }
  0x3a   :  { %1272 = vsyncadd [#allocation6], 4294967168 }
  0x3b   :  { %1273 = dma.done.wait [#allocation9], 4160  }
  0x3c   :  { %1274 = vsyncadd [#allocation9], 4294963136 }
  0x3d   :  { %1275 = dma.done.wait [#allocation12], 6144  }
  0x3e   :  { %1276 = vsyncadd [#allocation12], 4294961152  ;;  %v1013_v0 = vld [vmem:[#allocation8 + $0x74] ss:$8 sps:$4 sm:$0xff]   ;;  %v1015_v1 = vld [vmem:[#allocation8 + $0x70] ss:$8 sps:$4 sm:$0xff]   ;;  %v123_v33 = vstv %s1402_s6 }
  0x3f   :  { %344 = vmatprep.subr.bf16.mxu0 %v1013_v0  ;;  %v1016_v2 = vld [vmem:[#allocation8 + $0x64] ss:$8 sps:$4 sm:$0xff]   ;;  %v1018_v3 = vld [vmem:[#allocation8 + $0x60] ss:$8 sps:$4 sm:$0xff]   ;;  %v1019_v4 = vld [vmem:[#allocation8 + $0x54] ss:$8 sps:$4 sm:$0xff]  }
  0x40   :  { %345 = vmatpush1.bf16.msra.mxu0 %v1015_v1  ;;  %v1021_v5 = vld [vmem:[#allocation8 + $0x50] ss:$8 sps:$4 sm:$0xff]   ;;  %v1022_v6 = vld [vmem:[#allocation8 + $0x44] ss:$8 sps:$4 sm:$0xff]   ;;  %v1024_v7 = vld [vmem:[#allocation8 + $0x40] ss:$8 sps:$4 sm:$0xff]  }
  0x41   :  { %346 = vmatprep.subr.bf16.mxu0 %v1016_v2  ;;  %v1025_v8 = vld [vmem:[#allocation8 + $0x34] ss:$8 sps:$4 sm:$0xff]   ;;  %v1027_v9 = vld [vmem:[#allocation8 + $0x30] ss:$8 sps:$4 sm:$0xff]   ;;  %v1028_v10 = vld [vmem:[#allocation8 + $0x24] ss:$8 sps:$4 sm:$0xff]  }
  0x42   :  { %v1030_v11 = vld [vmem:[#allocation8 + $0x20] ss:$8 sps:$4 sm:$0xff]   ;;  %v1031_v12 = vld [vmem:[#allocation8 + $0x14] ss:$8 sps:$4 sm:$0xff]   ;;  %v1033_v13 = vld [vmem:[#allocation8 + $0x10] ss:$8 sps:$4 sm:$0xff]  }
  0x43   :  { %v1362_v14 = vld [vmem:[#allocation5] sm:$0xff]  ;;  %v1066_v18 = vld [vmem:[#allocation11 + $0x64] ss:$8 sps:$4 sm:$0xff]   ;;  %v1034_v19 = vld [vmem:[#allocation8 + $0x4] ss:$8 sps:$4 sm:$0xff]   ;;  %p114_p11 = scmp.lt.s32.totalorder %s1396_s0, 1 }
  0x44   :  { %347 = vmatpush1.bf16.msra.mxu0 %v1018_v3  ;;  %v897_v15 = vcombine.high %v1362_v14, %v1362_v14  ;;  %v1063_v16 = vld [vmem:[#allocation11 + $0x74] ss:$8 sps:$4 sm:$0xff]   ;;  %v1065_v17 = vld [vmem:[#allocation11 + $0x70] ss:$8 sps:$4 sm:$0xff]   ;;  %v1068_v21 = vld [vmem:[#allocation11 + $0x60] ss:$8 sps:$4 sm:$0xff]   ;;  %v896_v61 = vcombine.low %v1362_v14, %v1362_v14 }
  0x45   :  { %348 = vmatprep.subr.bf16.mxu0 %v1019_v4  ;;  %615 = vmatprep.subr.bf16.mxu1 %v1063_v16  ;;  %v1036_v20 = vld [vmem:[#allocation8] ss:$8 sps:$4 sm:$0xff]   ;;  %v1037_v23 = vld [vmem:[#allocation8 + $0xf4] ss:$8 sps:$4 sm:$0xff]   ;;  %s1408_s0 = smov (!%p114_p11, %s1396_s0), 1  ;;  %v1115_v14 = vld [vmem:[#allocation13 + $0x68] sm:$0xff]  }
  0x46   :  { %376 = vmatprep.mubr.bf16.mxu0 %v897_v15  ;;  %616 = vmatpush1.bf16.msra.mxu1 %v1065_v17  ;;  %v1069_v22 = vld [vmem:[#allocation11 + $0x54] ss:$8 sps:$4 sm:$0xff]   ;;  %v1071_v25 = vld [vmem:[#allocation11 + $0x50] ss:$8 sps:$4 sm:$0xff]   ;;  %v1072_v26 = vld [vmem:[#allocation11 + $0x44] ss:$8 sps:$4 sm:$0xff]  }
  0x47   :  { %617 = vmatprep.subr.bf16.mxu1 %v1066_v18  ;;  %v1039_v24 = vld [vmem:[#allocation8 + $0xf0] ss:$8 sps:$4 sm:$0xff]   ;;  %v1040_v27 = vld [vmem:[#allocation8 + $0xe4] ss:$8 sps:$4 sm:$0xff]   ;;  %s979_s21 = sshll.u32 %s1408_s0, 2  ;;  %v1119_v18 = vld [vmem:[#allocation13 + $0x58] sm:$0xff]  }
  0x48   :  { %349 = vmatpush1.bf16.msra.mxu0 %v1021_v5  ;;  %v1042_v28 = vld [vmem:[#allocation8 + $0xe0] ss:$8 sps:$4 sm:$0xff]   ;;  %v1074_v29 = vld [vmem:[#allocation11 + $0x40] ss:$8 sps:$4 sm:$0xff]   ;;  %v1043_v31 = vld [vmem:[#allocation8 + $0xd4] ss:$8 sps:$4 sm:$0xff]   ;;  %s118_s24 = scalar_lea.vmem %s1401_s5, %s979_s21 }
  0x49   :  { %350 = vmatprep.subr.bf16.mxu0 %v1022_v6  ;;  %v1075_v30 = vld [vmem:[#allocation11 + $0x34] ss:$8 sps:$4 sm:$0xff]   ;;  %v1046_v34 = vld [vmem:[#allocation8 + $0xc4] ss:$8 sps:$4 sm:$0xff]   ;;  %v1077_v35 = vld [vmem:[#allocation11 + $0x30] ss:$8 sps:$4 sm:$0xff]  }
  0x4a   :  { %618 = vmatpush1.bf16.msra.mxu1 %v1068_v21  ;;  %v1045_v32 = vld [vmem:[#allocation8 + $0xd0] ss:$8 sps:$4 sm:$0xff]   ;;  %v1080_v38 = vld [vmem:[#allocation11 + $0x20] ss:$8 sps:$4 sm:$0xff]   ;;  %v1048_v40 = vld [vmem:[#allocation8 + $0xc0] ss:$8 sps:$4 sm:$0xff]  }
  0x4b   :  { %619 = vmatprep.subr.bf16.mxu1 %v1069_v22  ;;  %v1078_v36 = vld [vmem:[#allocation11 + $0x24] ss:$8 sps:$4 sm:$0xff]   ;;  %v122_v37 = vld [vmem:[%s118_s24] sm:$0xf]  ;;  %v1049_v42 = vld [vmem:[#allocation8 + $0xb4] ss:$8 sps:$4 sm:$0xff]  }
  0x4c   :  { %351 = vmatpush1.bf16.msra.mxu0 %v1024_v7  ;;  %v124_v39 = vmul.f32 %v123_v33, %v122_v37  ;;  %v1081_v41 = vld [vmem:[#allocation11 + $0x14] ss:$8 sps:$4 sm:$0xff]   ;;  %v1083_v44 = vld [vmem:[#allocation11 + $0x10] ss:$8 sps:$4 sm:$0xff]   ;;  %v1084_v46 = vld [vmem:[#allocation11 + $0x4] ss:$8 sps:$4 sm:$0xff]  }
  0x4d   :  { %352 = vmatprep.subr.bf16.mxu0 %v1025_v8  ;;  %v1051_v45 = vld [vmem:[#allocation8 + $0xb0] ss:$8 sps:$4 sm:$0xff]   ;;  %v1052_v47 = vld [vmem:[#allocation8 + $0xa4] ss:$8 sps:$4 sm:$0xff]   ;;  %v1054_v49 = vld [vmem:[#allocation8 + $0xa0] ss:$8 sps:$4 sm:$0xff]  }
  0x4e   :  { %620 = vmatpush1.bf16.msra.mxu1 %v1071_v25  ;;  %v895_v43 = vmul.f32 -1.442695, %v124_v39  ;;  %v1086_v48 = vld [vmem:[#allocation11] ss:$8 sps:$4 sm:$0xff]   ;;  %v1087_v50 = vld [vmem:[#allocation11 + $0xf4] ss:$8 sps:$4 sm:$0xff]  }
  0x4f   :  { %621 = vmatprep.subr.bf16.mxu1 %v1072_v26  ;;  %v1055_v51 = vld [vmem:[#allocation8 + $0x94] ss:$8 sps:$4 sm:$0xff]   ;;  %v1057_v53 = vld [vmem:[#allocation8 + $0x90] ss:$8 sps:$4 sm:$0xff]   ;;  %v1058_v55 = vld [vmem:[#allocation8 + $0x84] ss:$8 sps:$4 sm:$0xff]  }
  0x50   :  { %353 = vmatpush1.bf16.msra.mxu0 %v1027_v9  ;;  %1127 = vpow2.f32 %v895_v43  ;;  %v1089_v52 = vld [vmem:[#allocation11 + $0xf0] ss:$8 sps:$4 sm:$0xff]   ;;  %v1090_v54 = vld [vmem:[#allocation11 + $0xe4] ss:$8 sps:$4 sm:$0xff]   ;;  %v1092_v57 = vld [vmem:[#allocation11 + $0xe0] ss:$8 sps:$4 sm:$0xff]  }
  0x51   :  { %354 = vmatprep.subr.bf16.mxu0 %v1028_v10  ;;  %v1060_v59 = vld [vmem:[#allocation8 + $0x80] ss:$8 sps:$4 sm:$0xff]   ;;  %v1095_v62 = vld [vmem:[#allocation11 + $0xd0] ss:$8 sps:$4 sm:$0xff]   ;;  %v1098_v0 = vld [vmem:[#allocation11 + $0xc0] ss:$8 sps:$4 sm:$0xff]  }
  0x52   :  { %622 = vmatpush1.bf16.msra.mxu1 %v1074_v29  ;;  %v1093_v60 = vld [vmem:[#allocation11 + $0xd4] ss:$8 sps:$4 sm:$0xff]   ;;  %v1096_v63 = vld [vmem:[#allocation11 + $0xc4] ss:$8 sps:$4 sm:$0xff]   ;;  %v1101_v2 = vld [vmem:[#allocation11 + $0xb0] ss:$8 sps:$4 sm:$0xff]  }
  0x53   :  { %623 = vmatprep.subr.bf16.mxu1 %v1075_v30  ;;  %v1099_v1 = vld [vmem:[#allocation11 + $0xb4] ss:$8 sps:$4 sm:$0xff]   ;;  %v1102_v4 = vld [vmem:[#allocation11 + $0xa4] ss:$8 sps:$4 sm:$0xff]   ;;  %v1104_v5 = vld [vmem:[#allocation11 + $0xa0] ss:$8 sps:$4 sm:$0xff]  }
  0x54   :  { %355 = vmatpush1.bf16.msra.mxu0 %v1030_v11  ;;  %v1105_v6 = vld [vmem:[#allocation11 + $0x94] ss:$8 sps:$4 sm:$0xff]   ;;  %v1107_v7 = vld [vmem:[#allocation11 + $0x90] ss:$8 sps:$4 sm:$0xff]   ;;  %v1108_v8 = vld [vmem:[#allocation11 + $0x84] ss:$8 sps:$4 sm:$0xff]  }
  0x55   :  { %356 = vmatprep.subr.bf16.mxu0 %v1031_v12  ;;  %v1110_v9 = vld [vmem:[#allocation11 + $0x80] ss:$8 sps:$4 sm:$0xff]   ;;  %v1111_v10 = vld [vmem:[#allocation13 + $0x78] sm:$0xff]   ;;  %v1113_v12 = vld [vmem:[#allocation13 + $0x70] sm:$0xff]   ;;  %s1290_s0 = smov [#allocation15]  }
  0x56   :  { %624 = vmatpush1.bf16.msra.mxu1 %v1077_v35  ;;  %v1112_v11 = vld [vmem:[#allocation13 + $0x38] sm:$0xff]   ;;  %v1116_v15 = vld [vmem:[#allocation13 + $0x28] sm:$0xff]   ;;  %v1117_v16 = vld [vmem:[#allocation13 + $0x60] sm:$0xff]   ;;  %s872_s5 = sshll.u32 %s1290_s0, 4  ;;  %s873_s5 = int_to_ptr.vmem [resolvable:$true] %s872_s5 }
  0x57   :  { %625 = vmatprep.subr.bf16.mxu1 %v1078_v36  ;;  %v1118_v17 = vld [vmem:[#allocation13 + $0x20] sm:$0xff]   ;;  %s1231_s6 = scalar_lea.vmem %s873_s5, 64  ;;  %p1236_p13 = scmp.lt.s32.totalorder %s873_s5, %s873_s5 }
  0x58   :  { %357 = vmatpush1.bf16.msra.mxu0 %v1033_v13  ;;  %v1114_v13 = vld [vmem:[#allocation13 + $0x30] sm:$0xff]   ;;  %p1232_p12 = scmp.ne.s32.totalorder %s873_s5, %s1231_s6  ;;  %p1237_p0 = scmp.lt.s32.totalorder %s1231_s6, %s1231_s6 }
  0x59   :  { %358 = vmatprep.subr.bf16.mxu0 %v1034_v19  ;;  %v1120_v19 = vld [vmem:[#allocation13 + $0x18] sm:$0xff]  }
  0x5a   :  { %626 = vmatpush1.bf16.msra.mxu1 %v1080_v38  ;;  %p1238_p1 = por %p1237_p0, %p1236_p13 }
  0x5b   :  { %627 = vmatprep.subr.bf16.mxu1 %v1081_v41 }
  0x5c   :  { %359 = vmatpush1.bf16.msra.mxu0 %v1036_v20  ;;  %v167_v20 = vlaneseq  ;;  %p1239_p2 = pnand %p1238_p1, %p1232_p12 }
  0x5d   :  { %360 = vmatprep.subr.bf16.mxu0 %v1037_v23  ;;  %v1128_v56 = vpop.eup %1127  ;;  %v165_v23 = vld [vmem:[#allocation10] ss:$2 sm:$0x3] }
  0x5e   :  { %628 = vmatpush1.bf16.msra.mxu1 %v1083_v44  ;;  %v128_v58 = vadd.f32 1.0, %v1128_v56  ;;  %v168_v21 = vshrl.u32 %v167_v20, 7  ;;  %v1121_v44 = vld [vmem:[#allocation13 + $0x50] sm:$0xff]  }
  0x5f   :  { %629 = vmatprep.subr.bf16.mxu1 %v1084_v46  ;;  %v1123_v46 = vld [vmem:[#allocation13 + $0x48] sm:$0xff]  }
  0x60   :  { %361 = vmatpush2.bf16.msra.mxu0 %v1039_v24  ;;  %1129 = vrcp.f32 %v128_v58  ;;  %v169_v22 = vsub.s32 0, %v168_v21  ;;  %v173_v24 = vsub.s32 1, %v168_v21  ;;  %v394_v25 = vsub.s32 2, %v168_v21 }
  0x61   :  { %362 = vmatprep.subr.bf16.mxu0 %v1040_v27 }
  0x62   :  { %630 = vmatpush1.bf16.msra.mxu1 %v1086_v48  ;;  %v170_v26 = vrot.slane %v165_v23, %v169_v22  ;;  %v1125_v48 = vld [vmem:[#allocation13 + $0x40] sm:$0xff]  }
  0x63   :  { %631 = vmatprep.subr.bf16.mxu1 %v1087_v50  ;;  %v443_v50 = vld [vmem:[#allocation10 + $0x1] ss:$2 sm:$0x3] }
  0x64   :  { %363 = vmatpush2.bf16.msra.mxu0 %v1042_v28  ;;  %v174_v28 = vrot.slane %v165_v23, %v173_v24 }
  0x65   :  { %364 = vmatprep.subr.bf16.mxu0 %v1043_v31 }
  0x66   :  { %632 = vmatpush2.bf16.msra.mxu1 %v1089_v52  ;;  %v448_v52 = vrot.slane %v443_v50, %v169_v22 }
  0x67   :  { %633 = vmatprep.subr.bf16.mxu1 %v1090_v54  ;;  %v452_v54 = vrot.slane %v443_v50, %v173_v24 }
  0x68   :  { %365 = vmatpush2.bf16.msra.mxu0 %v1045_v32 }
  0x69   :  { %366 = vmatprep.subr.bf16.mxu0 %v1046_v34 }
  0x6a   :  { %634 = vmatpush2.bf16.msra.mxu1 %v1092_v57 }
  0x6b   :  { %635 = vmatprep.subr.bf16.mxu1 %v1093_v60 }
  0x6c   :  { %367 = vmatpush2.bf16.msra.mxu0 %v1048_v40 }
  0x6d   :  { %368 = vmatprep.subr.bf16.mxu0 %v1049_v42  ;;  %v1380_v3 = vpop.eup %1129 }
  0x6e   :  { %636 = vmatpush2.bf16.msra.mxu1 %v1095_v62  ;;  %131 = vst [vmem:[#allocation15] sm:$0xf] %v1380_v3  ;;  %v391_v27 = vrot.slane %v1380_v3, %v169_v22  ;;  %v395_v29 = vrot.slane %v1380_v3, %v394_v25 }
  0x6f   :  { %637 = vmatprep.subr.bf16.mxu1 %v1096_v63 }
  0x70   :  { %369 = vmatpush2.bf16.msra.mxu0 %v1051_v45  ;;  %v401_v32 = vrot.slane %v391_v27, %v169_v22  ;;  %v405_v36 = vrot.slane %v395_v29, %v169_v22  ;;  %v1122_v45 = vld [vmem:[#allocation13 + $0x10] sm:$0xff]  }
  0x71   :  { %370 = vmatprep.subr.bf16.mxu0 %v1052_v47  ;;  %v1124_v47 = vld [vmem:[#allocation13 + $0x8] sm:$0xff]  }
  0x72   :  { %638 = vmatpush2.bf16.msra.mxu1 %v1098_v0 }
  0x73   :  { %639 = vmatprep.subr.bf16.mxu1 %v1099_v1 }
  0x74   :  { %371 = vmatpush2.bf16.msra.mxu0 %v1054_v49  ;;  %v1126_v49 = vld [vmem:[#allocation13] sm:$0xff]  }
  0x75   :  { %372 = vmatprep.subr.bf16.mxu0 %v1055_v51  ;;  %v664_v51 = vsub.s32 3, %v168_v21 }
  0x76   :  { %640 = vmatpush2.bf16.msra.mxu1 %v1101_v2 }
  0x77   :  { %641 = vmatprep.subr.bf16.mxu1 %v1102_v4 }
  0x78   :  { %373 = vmatpush2.bf16.msra.mxu0 %v1057_v53  ;;  %v661_v53 = vrot.slane %v1380_v3, %v173_v24 }
  0x79   :  { %374 = vmatprep.subr.bf16.mxu0 %v1058_v55  ;;  %v665_v55 = vrot.slane %v1380_v3, %v664_v51 }
  0x7a   :  { %642 = vmatpush2.bf16.msra.mxu1 %v1104_v5  ;;  %v671_v58 = vrot.slane %v661_v53, %v173_v24 }
  0x7b   :  { %643 = vmatprep.subr.bf16.mxu1 %v1105_v6  ;;  %v675_v62 = vrot.slane %v665_v55, %v173_v24 }
  0x7c   :  { %375 = vmatpush2.bf16.msra.mxu0 %v1060_v59 }
  0x7d   :  { %980 = vmatprep.subr.bf16.mxu0 %v1111_v10 }
  0x7e   :  { %644 = vmatpush2.bf16.msra.mxu1 %v1107_v7 }
  0x7f   :  { %377 = vmatmul.mubr.bf16.vlgmr.msra.gmra.mxu0 %v896_v61  ;;  %645 = vmatprep.subr.bf16.mxu1 %v1108_v8 }
  0x80   :  { %981 = vmatpush3.bf16.msra.mxu0 %v1112_v11 }
  0x81   :  { %982 = vmatprep.subr.bf16.mxu0 %v1113_v12 }
  0x82   :  { %646 = vmatpush2.bf16.msra.mxu1 %v1110_v9 }
  0x84   :  { %983 = vmatpush3.bf16.msra.mxu0 %v1114_v13 }
  0x85   :  { %984 = vmatprep.subr.bf16.mxu0 %v1115_v14 }
  0x88   :  { %985 = vmatpush3.bf16.msra.mxu0 %v1116_v15 }
  0x89   :  { %986 = vmatprep.subr.bf16.mxu0 %v1117_v16 }
  0x8c   :  { %987 = vmatpush3.bf16.msra.mxu0 %v1118_v17 }
  0x8d   :  { %988 = vmatprep.subr.bf16.mxu0 %v1119_v18 }
  0x90   :  { %989 = vmatpush3.bf16.msra.mxu0 %v1120_v19 }
  0x91   :  { %990 = vmatprep.subr.bf16.mxu0 %v1121_v44 }
  0x94   :  { %991 = vmatpush3.bf16.msra.mxu0 %v1122_v45 }
  0x95   :  { %992 = vmatprep.subr.bf16.mxu0 %v1123_v46 }
  0x98   :  { %993 = vmatpush3.bf16.msra.mxu0 %v1124_v47 }
  0x99   :  { %994 = vmatprep.subr.bf16.mxu0 %v1125_v48 }
  0x9c   :  { %995 = vmatpush3.bf16.msra.mxu0 %v1126_v49 }
 0x13f   :  { %v378_v30 = vpop.f32.mrf.mxu0 }
 0x140   :  { %v379_v31 = vadd.f32 %v378_v30, %v170_v26 }
 0x141   :  { %v380_v33 = vpop.f32.mrf.mxu0 }
 0x142   :  { %v385_v34 = vmax.f32 %v379_v31, 0.0  ;;  %v381_v35 = vadd.f32 %v380_v33, %v174_v28 }
 0x143   :  { %v382_v37 = vpop.f32.mrf.mxu0 }
 0x144   :  { %v386_v38 = vmax.f32 %v381_v35, 0.0  ;;  %v406_v39 = vmul.f32 %v401_v32, %v385_v34 }
 0x145   :  { %v383_v40 = vpop.f32.mrf.mxu0 }
 0x146   :  { %v407_v41 = vmul.f32 %v405_v36, %v386_v38  ;;  %v408_v43 = vpack.c.bf16 %v406_v39, %v406_v39 }
 0x148   :  { %v409_v42 = vpack.c.bf16 %v407_v41, %v407_v41 }
 0x14a   :  { %647 = vmatprep.mubr.bf16.mxu1 %v409_v42 }
 0x14b   :  { %648 = vmatmul.mubr.bf16.vlgmr.msra.gmra.mxu1 %v408_v43 }
 0x20b   :  { %v649_v56 = vpop.f32.mrf.mxu1 }
 0x20c   :  { %v650_v57 = vadd.f32 %v649_v56, %v448_v52 }
 0x20d   :  { %v651_v59 = vpop.f32.mrf.mxu1 }
 0x20e   :  { %v656_v60 = vmax.f32 %v650_v57, 0.0  ;;  %v652_v61 = vadd.f32 %v651_v59, %v452_v54 }
 0x20f   :  { %v653_v63 = vpop.f32.mrf.mxu1 }
 0x210   :  { %v657_v0 = vmax.f32 %v652_v61, 0.0  ;;  %v676_v1 = vmul.f32 %v671_v58, %v656_v60 }
 0x211   :  { %v654_v2 = vpop.f32.mrf.mxu1 }
 0x212   :  { %v677_v4 = vmul.f32 %v675_v62, %v657_v0  ;;  %v678_v6 = vpack.c.bf16 %v676_v1, %v676_v1 }
 0x214   :  { %v679_v5 = vpack.c.bf16 %v677_v4, %v677_v4 }
 0x216   :  { %847 = vmatprep.mubr.bf16.mxu0 %v679_v5 }
 0x217   :  { %848 = vmatmul.mubr.bf16.vlgmr.msra.gmra.mxu0 %v678_v6 }
 0x218   :  { %1242 = shalt.err (!%p1239_p2)
}
 0x219   :  { %875 = dma.vmem_to_hbm [thread:$0]  %s873_s5, 64, %s1406_s10, [#allocation16]   ;;  %v962_v7 = vld [vmem:[%s1404_s8] ss:$0 sm:$0xff] }
 0x21a   :  { %s1291_s30 = smov [#allocation14]  }
 0x21b   :  { %s862_s11 = sshll.u32 %s1291_s30, 4  ;;  %s863_s11 = int_to_ptr.vmem [resolvable:$true] %s862_s11 }
 0x21c   :  { %s1251_s12 = scalar_lea.vmem %s863_s11, 128  ;;  %p1256_p4 = scmp.lt.s32.totalorder %s863_s11, %s863_s11 }
 0x21d   :  { %p1252_p3 = scmp.ne.s32.totalorder %s863_s11, %s1251_s12  ;;  %p1257_p5 = scmp.lt.s32.totalorder %s1251_s12, %s1251_s12 }
 0x21f   :  { %p1258_p6 = por %p1257_p5, %p1256_p4 }
 0x221   :  { %p1259_p7 = pnand %p1258_p6, %p1252_p3 }
 0x2d7   :  { %v996_v3 = vpop.f32.mrf.mxu0 }
 0x2d9   :  { %v997_v8 = vpop.f32.mrf.mxu0 }
 0x2da   :  { %v998_v9 = vadd.f32 %v997_v8, %v996_v3 }
 0x2db   :  { %v999_v10 = vpop.f32.mrf.mxu0 }
 0x2dc   :  { %v850_v11 = vadd.f32 %v998_v9, %v962_v7 }
 0x2dd   :  { %v1000_v12 = vpop.f32.mrf.mxu0 }
 0x2de   :  { %855 = vst [vmem:[#allocation14] sm:$0xff] %v850_v11 }
 0x2df   :  { %1262 = shalt.err (!%p1259_p7)
}
 0x2e0   :  { %865 = dma.vmem_to_hbm [thread:$0]  %s863_s11, 128, %s1405_s9, [#allocation7]  }
 0x2e1   :  { %1277 = dma.done.wait [#allocation7], 128  }
 0x2e2   :  { %1278 = vsyncadd [#allocation7], 4294967168 }
 0x2e3   :  { %1279 = dma.done.wait [#allocation16], 64  }
 0x2e4   :  { %1280 = vsyncadd [#allocation16], 4294967232 }
 0x2e5   :  { %882 = vsyncpa [#allocation6], 1 }
 0x2e6   :  { %883 = vsyncpa [#allocation9], 1 }
 0x2e7   :  { %884 = vsyncpa [#allocation12], 1 }
 0x2e8   :  { %885 = vsyncpa [#allocation7], 1 }
 0x2e9   :  { %886 = vsyncpa [#allocation16], 1 }

</bundles_post_ra>
